<compile_context>
chip_gen: v7x
topology: tpu7x:2x2x1
jax: 0.10.0
libtpu: 0.0.40
codegen_flags: <defaults>
</compile_context>

<pallas_src>
import jax
import jax.numpy as jnp
from jax.experimental import pallas as pl
from jax.experimental.pallas import tpu as pltpu

EPS = 1e-5


def _bn_relu(h, gamma, beta):
    """Fused batch-norm (batch stats, biased var) + affine + ReLU, all f32."""
    mean = jnp.mean(h, axis=0, keepdims=True)
    var = jnp.mean(h * h, axis=0, keepdims=True) - mean * mean
    scale = gamma * jax.lax.rsqrt(var + EPS)
    shift = beta - mean * scale
    return jnp.maximum(h * scale + shift, 0.0)


def _critic_bn_kernel(x_ref, w1_ref, p1_ref, w2_ref, p2_ref, w3_ref, b3_ref,
                      out_ref):
    # p{i}_ref = [gamma; beta] as a [2, F] slab.  Linear biases are omitted on
    # purpose: a per-feature bias before BatchNorm cancels exactly.
    x = x_ref[...]                                                  # bf16 [B, in]
    h1 = jnp.dot(x, w1_ref[...], preferred_element_type=jnp.float32)
    h1 = _bn_relu(h1, p1_ref[0:1, :], p1_ref[1:2, :])               # dropout = id
    h2 = jnp.dot(h1.astype(jnp.bfloat16), w2_ref[...],
                 preferred_element_type=jnp.float32)
    h2 = _bn_relu(h2, p2_ref[0:1, :], p2_ref[1:2, :])               # dropout = id
    # width-1 output layer: VPU mul + XLU lane reduce instead of MXU matvec.
    out_ref[...] = jnp.sum(h2 * w3_ref[...], axis=-1, keepdims=True) + b3_ref[...]


def _critic_nobn_kernel(x_ref, w1_ref, b1_ref, w2_ref, b2_ref, w3_ref, b3_ref,
                        out_ref):
    x = x_ref[...]                                                  # bf16 [TB, in]
    h1 = jnp.maximum(
        jnp.dot(x, w1_ref[...], preferred_element_type=jnp.float32) + b1_ref[...],
        0.0)
    h2 = jnp.maximum(
        jnp.dot(h1.astype(jnp.bfloat16), w2_ref[...],
                preferred_element_type=jnp.float32) + b2_ref[...],
        0.0)
    out_ref[...] = jnp.sum(h2 * w3_ref[...], axis=-1, keepdims=True) + b3_ref[...]


def _vmem_limit_bytes(B, in_size, H1, H2):
    acts = 4 * B * (in_size + H1 + H2 + 8)                 # f32 activations
    weights = 2 * (in_size * H1 + H1 * H2) + 4 * (2 * H1 + 3 * H2 + 16)
    need = 2 * (acts + weights) + (4 << 20)
    # cap at 64 MiB: v7x physical VMEM (v5e/v6e have 128 MiB).
    return int(min(max(need, 16 << 20), 64 << 20))


def critic_forward(x, params, use_batch_norm=True, batch_tile=256):
    """x: [B, input_size] f32.  params: see init_params()."""
    B, in_size = x.shape
    H1 = params["w1"].shape[1]
    H2 = params["w2"].shape[1]
    out_size = params["w3"].shape[1]
    if out_size != 1:
        raise NotImplementedError("this kernel assumes output_size == 1")

    use_bn = bool(use_batch_norm) and B > 1      # mirrors `x.size(0) > 1` guard

    # bf16 MXU inputs; everything elementwise stays f32.
    x_bf = x.astype(jnp.bfloat16)
    w1_bf = params["w1"].astype(jnp.bfloat16)
    w2_bf = params["w2"].astype(jnp.bfloat16)
    w3_row = params["w3"].T.astype(jnp.float32)            # [1, H2]
    b3 = params["b3"].astype(jnp.float32)                  # [1, 1]

    vmem = pl.BlockSpec(memory_space=pltpu.MemorySpace.VMEM)

    if use_bn:
        # BN couples the whole batch -> single-shot, batch resident in VMEM.
        p1 = jnp.concatenate([params["g1"], params["be1"]], axis=0)   # [2, H1]
        p2 = jnp.concatenate([params["g2"], params["be2"]], axis=0)   # [2, H2]
        args = (x_bf, w1_bf, p1, w2_bf, p2, w3_row, b3)
        return pl.pallas_call(
            _critic_bn_kernel,
            out_shape=jax.ShapeDtypeStruct((B, 1), jnp.float32),
            in_specs=[vmem] * len(args),
            out_specs=vmem,
            compiler_params=pltpu.CompilerParams(
                vmem_limit_bytes=_vmem_limit_bytes(B, in_size, H1, H2)),
        )(*args)

    # no-BN path: rows are independent -> batch-tiled grid, weights resident.
    args = (x_bf, w1_bf, params["b1"], w2_bf, params["b2"], w3_row, b3)
    TB = batch_tile
    if B > TB and B % TB == 0:
        in_specs = [
            pl.BlockSpec((TB, in_size), lambda i: (i, 0)),
            pl.BlockSpec((in_size, H1), lambda i: (0, 0)),
            pl.BlockSpec((1, H1), lambda i: (0, 0)),
            pl.BlockSpec((H1, H2), lambda i: (0, 0)),
            pl.BlockSpec((1, H2), lambda i: (0, 0)),
            pl.BlockSpec((1, H2), lambda i: (0, 0)),
            pl.BlockSpec((1, 1), lambda i: (0, 0)),
        ]
        return pl.pallas_call(
            _critic_nobn_kernel,
            out_shape=jax.ShapeDtypeStruct((B, 1), jnp.float32),
            grid=(B // TB,),
            in_specs=in_specs,
            out_specs=pl.BlockSpec((TB, 1), lambda i: (i, 0)),
            compiler_params=pltpu.CompilerParams(
                dimension_semantics=("parallel",)),
        )(*args)

    return pl.pallas_call(
        _critic_nobn_kernel,
        out_shape=jax.ShapeDtypeStruct((B, 1), jnp.float32),
        in_specs=[vmem] * len(args),
        out_specs=vmem,
        compiler_params=pltpu.CompilerParams(
            vmem_limit_bytes=_vmem_limit_bytes(B, in_size, H1, H2)),
    )(*args)


def init_params(key, input_size, hidden_sizes=(256, 128), output_size=1):
    """Deterministic synthetic init matching the module's init_weights()."""
    keys = jax.random.split(key, 4)
    params = {}
    sizes = [input_size] + list(hidden_sizes)

    # hidden layers: kaiming_normal_ (fan_in, relu) weights, zero bias,
    # BatchNorm1d default affine params (gamma=1, beta=0).
    for i, (fan_in, fan_out) in enumerate(zip(sizes[:-1], sizes[1:]), start=1):
        std = (2.0 / fan_in) ** 0.5
        params[f"w{i}"] = jax.random.normal(
            keys[i - 1], (fan_in, fan_out), jnp.float32) * std
        params[f"b{i}"] = jnp.zeros((1, fan_out), jnp.float32)
        params[f"g{i}"] = jnp.ones((1, fan_out), jnp.float32)
        params[f"be{i}"] = jnp.zeros((1, fan_out), jnp.float32)

    # output layer: PyTorch default Linear init (uniform(+-1/sqrt(fan_in))).
    fan_in = hidden_sizes[-1]
    bound = 1.0 / (fan_in ** 0.5)
    params["w3"] = jax.random.uniform(
        keys[2], (fan_in, output_size), jnp.float32, -bound, bound)
    params["b3"] = jax.random.uniform(
        keys[3], (1, output_size), jnp.float32, -bound, bound)
    return params


def reference_forward(x, params, use_batch_norm=True):
    """Pure-JAX f32 reference of the PyTorch forward (dropout = identity)."""
    h = x
    for i in (1, 2):
        h = h @ params[f"w{i}"] + params[f"b{i}"]
        if use_batch_norm and h.shape[0] > 1:
            mean = h.mean(0, keepdims=True)
            var = ((h - mean) ** 2).mean(0, keepdims=True)
            h = (h - mean) / jnp.sqrt(var + EPS)
            h = h * params[f"g{i}"] + params[f"be{i}"]
        h = jnp.maximum(h, 0.0)
    return h @ params["w3"] + params["b3"]


if __name__ == "__main__":
    key = jax.random.PRNGKey(0)
    k_x, k_p, k_x2 = jax.random.split(key, 3)

    B, INPUT_SIZE = 8, 32
    params = init_params(k_p, INPUT_SIZE, hidden_sizes=(256, 128), output_size=1)

    # 1) BN path (train-mode batch statistics), single-shot kernel.
    x = jax.random.normal(k_x, (B, INPUT_SIZE), jnp.float32)
    out = critic_forward(x, params, use_batch_norm=True)
    jax.block_until_ready(out)
    assert out.shape == (B, 1) and out.dtype == jnp.float32
    ref = reference_forward(x, params, use_batch_norm=True)
    assert jnp.allclose(out, ref, rtol=0.1, atol=0.1), "BN path mismatch"

    # 2) no-BN path, batch-tiled grid (weights VMEM-resident, parallel batch axis).
    B2 = 512
    x2 = jax.random.normal(k_x2, (B2, INPUT_SIZE), jnp.float32)
    out2 = critic_forward(x2, params, use_batch_norm=False, batch_tile=256)
    jax.block_until_ready(out2)
    assert out2.shape == (B2, 1) and out2.dtype == jnp.float32
    ref2 = reference_forward(x2, params, use_batch_norm=False)
    assert jnp.allclose(out2, ref2, rtol=0.1, atol=0.1), "no-BN path mismatch"

    print("KERNEL_OK")
</pallas_src>

<mosaic_0001>
module attributes {stable_mosaic.version = 11 : i64} {
  func.func @_critic_bn_kernel(%arg0: memref<8x32xbf16, #tpu.memory_space<vmem>>, %arg1: memref<32x256xbf16, #tpu.memory_space<vmem>>, %arg2: memref<2x256xf32, #tpu.memory_space<vmem>>, %arg3: memref<256x128xbf16, #tpu.memory_space<vmem>>, %arg4: memref<2x128xf32, #tpu.memory_space<vmem>>, %arg5: memref<1x128xf32, #tpu.memory_space<vmem>>, %arg6: memref<1x1xf32, #tpu.memory_space<vmem>>, %arg7: memref<8x1xf32, #tpu.memory_space<vmem>>) attributes {dimension_semantics = [], scalar_prefetch = 0 : i64, scratch_operands = 0 : i64, tpu.core_type = #tpu.core_type<tc>} {
    %c0 = arith.constant 0 : index
    %c0_0 = arith.constant 0 : index
    %0 = vector.load %arg0[%c0, %c0_0] : memref<8x32xbf16, #tpu.memory_space<vmem>>, vector<8x32xbf16>
    %c0_1 = arith.constant 0 : index
    %c0_2 = arith.constant 0 : index
    %1 = vector.load %arg1[%c0_1, %c0_2] : memref<32x256xbf16, #tpu.memory_space<vmem>>, vector<32x256xbf16>
    %cst = arith.constant dense<0.000000e+00> : vector<8x256xf32>
    %2 = tpu.matmul %0, %1, %cst {dimension_numbers = #tpu.dot_dimension_numbers<[1], [0], [0], [1], [0, 0, 1, 1], [], []>} : vector<8x32xbf16>, vector<32x256xbf16>, vector<8x256xf32> -> vector<8x256xf32>
    %c0_3 = arith.constant 0 : index
    %c0_4 = arith.constant 0 : index
    %3 = vector.load %arg2[%c0_3, %c0_4] : memref<2x256xf32, #tpu.memory_space<vmem>>, vector<1x256xf32>
    %c1 = arith.constant 1 : index
    %c0_5 = arith.constant 0 : index
    %4 = vector.load %arg2[%c1, %c0_5] : memref<2x256xf32, #tpu.memory_space<vmem>>, vector<1x256xf32>
    %cst_6 = arith.constant dense<0.000000e+00> : vector<256xf32>
    %5 = vector.multi_reduction <add>, %2, %cst_6 [0] : vector<8x256xf32> to vector<256xf32>
    %6 = vector.shape_cast %5 : vector<256xf32> to vector<1x256xf32>
    %cst_7 = arith.constant 8.000000e+00 : f32
    %7 = vector.broadcast %cst_7 : f32 to vector<1x256xf32>
    %8 = arith.divf %6, %7 : vector<1x256xf32>
    %9 = arith.mulf %2, %2 : vector<8x256xf32>
    %cst_8 = arith.constant dense<0.000000e+00> : vector<256xf32>
    %10 = vector.multi_reduction <add>, %9, %cst_8 [0] : vector<8x256xf32> to vector<256xf32>
    %11 = vector.shape_cast %10 : vector<256xf32> to vector<1x256xf32>
    %cst_9 = arith.constant 8.000000e+00 : f32
    %12 = vector.broadcast %cst_9 : f32 to vector<1x256xf32>
    %13 = arith.divf %11, %12 : vector<1x256xf32>
    %14 = arith.mulf %8, %8 : vector<1x256xf32>
    %15 = arith.subf %13, %14 : vector<1x256xf32>
    %cst_10 = arith.constant 9.99999974E-6 : f32
    %16 = vector.broadcast %cst_10 : f32 to vector<1x256xf32>
    %17 = arith.addf %15, %16 : vector<1x256xf32>
    %18 = math.rsqrt %17 : vector<1x256xf32>
    %19 = arith.mulf %3, %18 : vector<1x256xf32>
    %20 = arith.mulf %8, %19 : vector<1x256xf32>
    %21 = arith.subf %4, %20 : vector<1x256xf32>
    %22 = vector.broadcast %19 : vector<1x256xf32> to vector<8x256xf32>
    %23 = arith.mulf %2, %22 : vector<8x256xf32>
    %24 = vector.broadcast %21 : vector<1x256xf32> to vector<8x256xf32>
    %25 = arith.addf %23, %24 : vector<8x256xf32>
    %cst_11 = arith.constant 0.000000e+00 : f32
    %26 = vector.broadcast %cst_11 : f32 to vector<8x256xf32>
    %27 = arith.maximumf %25, %26 : vector<8x256xf32>
    %28 = arith.truncf %27 : vector<8x256xf32> to vector<8x256xbf16>
    %c0_12 = arith.constant 0 : index
    %c0_13 = arith.constant 0 : index
    %29 = vector.load %arg3[%c0_12, %c0_13] : memref<256x128xbf16, #tpu.memory_space<vmem>>, vector<256x128xbf16>
    %cst_14 = arith.constant dense<0.000000e+00> : vector<8x128xf32>
    %30 = tpu.matmul %28, %29, %cst_14 {dimension_numbers = #tpu.dot_dimension_numbers<[1], [0], [0], [1], [0, 0, 1, 1], [], []>} : vector<8x256xbf16>, vector<256x128xbf16>, vector<8x128xf32> -> vector<8x128xf32>
    %c0_15 = arith.constant 0 : index
    %c0_16 = arith.constant 0 : index
    %31 = vector.load %arg4[%c0_15, %c0_16] : memref<2x128xf32, #tpu.memory_space<vmem>>, vector<1x128xf32>
    %c1_17 = arith.constant 1 : index
    %c0_18 = arith.constant 0 : index
    %32 = vector.load %arg4[%c1_17, %c0_18] : memref<2x128xf32, #tpu.memory_space<vmem>>, vector<1x128xf32>
    %cst_19 = arith.constant dense<0.000000e+00> : vector<128xf32>
    %33 = vector.multi_reduction <add>, %30, %cst_19 [0] : vector<8x128xf32> to vector<128xf32>
    %34 = vector.shape_cast %33 : vector<128xf32> to vector<1x128xf32>
    %cst_20 = arith.constant 8.000000e+00 : f32
    %35 = vector.broadcast %cst_20 : f32 to vector<1x128xf32>
    %36 = arith.divf %34, %35 : vector<1x128xf32>
    %37 = arith.mulf %30, %30 : vector<8x128xf32>
    %cst_21 = arith.constant dense<0.000000e+00> : vector<128xf32>
    %38 = vector.multi_reduction <add>, %37, %cst_21 [0] : vector<8x128xf32> to vector<128xf32>
    %39 = vector.shape_cast %38 : vector<128xf32> to vector<1x128xf32>
    %cst_22 = arith.constant 8.000000e+00 : f32
    %40 = vector.broadcast %cst_22 : f32 to vector<1x128xf32>
    %41 = arith.divf %39, %40 : vector<1x128xf32>
    %42 = arith.mulf %36, %36 : vector<1x128xf32>
    %43 = arith.subf %41, %42 : vector<1x128xf32>
    %cst_23 = arith.constant 9.99999974E-6 : f32
    %44 = vector.broadcast %cst_23 : f32 to vector<1x128xf32>
    %45 = arith.addf %43, %44 : vector<1x128xf32>
    %46 = math.rsqrt %45 : vector<1x128xf32>
    %47 = arith.mulf %31, %46 : vector<1x128xf32>
    %48 = arith.mulf %36, %47 : vector<1x128xf32>
    %49 = arith.subf %32, %48 : vector<1x128xf32>
    %50 = vector.broadcast %47 : vector<1x128xf32> to vector<8x128xf32>
    %51 = arith.mulf %30, %50 : vector<8x128xf32>
    %52 = vector.broadcast %49 : vector<1x128xf32> to vector<8x128xf32>
    %53 = arith.addf %51, %52 : vector<8x128xf32>
    %cst_24 = arith.constant 0.000000e+00 : f32
    %54 = vector.broadcast %cst_24 : f32 to vector<8x128xf32>
    %55 = arith.maximumf %53, %54 : vector<8x128xf32>
    %c0_25 = arith.constant 0 : index
    %c0_26 = arith.constant 0 : index
    %56 = vector.load %arg5[%c0_25, %c0_26] : memref<1x128xf32, #tpu.memory_space<vmem>>, vector<1x128xf32>
    %57 = vector.broadcast %56 : vector<1x128xf32> to vector<8x128xf32>
    %58 = arith.mulf %55, %57 : vector<8x128xf32>
    %cst_27 = arith.constant dense<0.000000e+00> : vector<8xf32>
    %59 = vector.multi_reduction <add>, %58, %cst_27 [1] : vector<8x128xf32> to vector<8xf32>
    %60 = vector.shape_cast %59 : vector<8xf32> to vector<8x1xf32>
    %c0_28 = arith.constant 0 : index
    %c0_29 = arith.constant 0 : index
    %61 = vector.load %arg6[%c0_28, %c0_29] : memref<1x1xf32, #tpu.memory_space<vmem>>, vector<1x1xf32>
    %62 = vector.broadcast %61 : vector<1x1xf32> to vector<8x1xf32>
    %63 = arith.addf %60, %62 : vector<8x1xf32>
    %c0_30 = arith.constant 0 : index
    %c0_31 = arith.constant 0 : index
    %64 = vector.load %arg7[%c0_30, %c0_31] : memref<8x1xf32, #tpu.memory_space<vmem>>, vector<8x1xf32>
    tpu.vector_store %arg7[%c0_30, %c0_31], %63 {strides = array<i32>} : memref<8x1xf32, #tpu.memory_space<vmem>>, vector<8x1xf32>,
    return
  }
}

</mosaic_0001>

<bundles_post_ra>
// kernel: tpu_custom_call.1
= control target key start
LH: loop header
LB: loop body
LE: loop exit
PB: predicated region body
PF: predicated region fallthrough
CT: control target
= control target key end

     0   :  { %s738_s0 = inlined_call_operand.hbm [shape: bf16[8,32], index: 0, kind: input, shape index: {}]   ;;  %s739_s1 = inlined_call_operand.hbm [shape: bf16[32,256], index: 1, kind: input, shape index: {}]   ;;  %s740_s2 = inlined_call_operand.vmem [shape: f32[2,256], index: 2, kind: input, shape index: {}]   ;;  %s741_s3 = inlined_call_operand.hbm [shape: bf16[256,128], index: 3, kind: input, shape index: {}]   ;;  %s742_s4 = inlined_call_operand.vmem [shape: f32[2,128], index: 4, kind: input, shape index: {}]   ;;  %s743_s5 = inlined_call_operand.vmem [shape: f32[1,128], index: 5, kind: input, shape index: {}]   ;;  %s744_s6 = inlined_call_operand.<no memory space> [shape: f32[1,1], index: 6, kind: input, shape index: {}]   ;;  %s745_s7 = inlined_call_operand.vmem [shape: f32[8,1], index: 7, kind: output, shape index: {}]  }
   0x1   :  { %v12_v0 = vstv %s744_s6 }
   0x2   :  { %13 = vst [vmem:[#allocation2] sm:$0x1] %v12_v0 }
   0x3   :  { %14 = vsyncpa [#allocation4], 0 }
   0x4   :  { %15 = vsyncpa [#allocation6], 0  ;;  %s632_s26 = smov [#allocation5]   ;;  %s562_s30 = scalar_lea.hbm %s739_s1, 512 }
   0x5   :  { %s31_s27 = sshll.u32 %s632_s26, 4  ;;  %p563_p0 = scmp.ne.s32.totalorder %s739_s1, %s562_s30  ;;  %s32_s27 = int_to_ptr.vmem [resolvable:$true] %s31_s27 }
   0x6   :  { %p566_p1 = scmp.lt.u32.totalorder %s562_s30, %s739_s1 }
   0x8   :  { %p568_p2 = pnand %p566_p1, %p563_p0 }
   0xa   :  { %571 = shalt.err (!%p568_p2)
}
   0xb   :  { %s572_s6 = scalar_lea.vmem %s32_s27, 512  ;;  %p577_p4 = scmp.lt.s32.totalorder %s32_s27, %s32_s27 }
   0xc   :  { %p573_p3 = scmp.ne.s32.totalorder %s32_s27, %s572_s6  ;;  %p578_p5 = scmp.lt.s32.totalorder %s572_s6, %s572_s6 }
   0xe   :  { %p579_p6 = por %p578_p5, %p577_p4 }
  0x10   :  { %p580_p7 = pnand %p579_p6, %p573_p3 }
  0x12   :  { %583 = shalt.err (!%p580_p7)
}
  0x13   :  { %s633_s12 = smov 128   ;;  %s634_s13 = smov 8  }
  0x14   :  { %37 = dma.hbm_to_vmem [thread:$0]  %s739_s1, 512, %s32_s27, [#allocation6], %s633_s12, %s633_s12, %s634_s13  }
  0x15   :  { %s635_s16 = smov [#allocation3]   ;;  %s636_s18 = smov [#allocation7]  }
  0x16   :  { %s22_s17 = sshll.u32 %s635_s16, 4  ;;  %s45_s19 = sshll.u32 %s636_s18, 4  ;;  %s23_s17 = int_to_ptr.vmem [resolvable:$true] %s22_s17  ;;  %s46_s19 = int_to_ptr.vmem [resolvable:$true] %s45_s19 }
  0x17   :  { %s584_s22 = scalar_lea.hbm %s738_s0, 64 }
  0x18   :  { %p585_p8 = scmp.ne.s32.totalorder %s738_s0, %s584_s22  ;;  %p588_p9 = scmp.lt.u32.totalorder %s584_s22, %s738_s0 }
  0x1a   :  { %p590_p10 = pnand %p588_p9, %p585_p8 }
  0x1c   :  { %593 = shalt.err (!%p590_p10)
}
  0x1d   :  { %s594_s1 = scalar_lea.vmem %s23_s17, 64  ;;  %p599_p12 = scmp.lt.s32.totalorder %s23_s17, %s23_s17 }
  0x1e   :  { %p595_p11 = scmp.ne.s32.totalorder %s23_s17, %s594_s1  ;;  %p600_p13 = scmp.lt.s32.totalorder %s594_s1, %s594_s1 }
  0x20   :  { %p601_p0 = por %p600_p13, %p599_p12 }
  0x22   :  { %p602_p1 = pnand %p601_p0, %p595_p11 }
  0x24   :  { %605 = shalt.err (!%p602_p1)
}
  0x25   :  { %25 = dma.hbm_to_vmem [thread:$0]  %s738_s0, 64, %s23_s17, [#allocation4]  }
  0x26   :  { %s606_s8 = scalar_lea.hbm %s741_s3, 2048 }
  0x27   :  { %p607_p2 = scmp.ne.s32.totalorder %s741_s3, %s606_s8  ;;  %p610_p3 = scmp.lt.u32.totalorder %s606_s8, %s741_s3 }
  0x29   :  { %p612_p4 = pnand %p610_p3, %p607_p2 }
  0x2b   :  { %615 = shalt.err (!%p612_p4)
}
  0x2c   :  { %s616_s12 = scalar_lea.vmem %s46_s19, 2048  ;;  %p621_p6 = scmp.lt.s32.totalorder %s46_s19, %s46_s19 }
  0x2d   :  { %p617_p5 = scmp.ne.s32.totalorder %s46_s19, %s616_s12  ;;  %p622_p7 = scmp.lt.s32.totalorder %s616_s12, %s616_s12 }
  0x2f   :  { %p623_p8 = por %p622_p7, %p621_p6 }
  0x31   :  { %p624_p9 = pnand %p623_p8, %p617_p5 }
  0x33   :  { %627 = shalt.err (!%p624_p9)
}
  0x34   :  { %s637_s0 = smov 64   ;;  %s638_s13 = smov 4  }
  0x35   :  { %51 = dma.hbm_to_vmem [thread:$0]  %s741_s3, 2048, %s46_s19, [#allocation6], %s637_s0, %s637_s0, %s638_s13  }
  0x36   :  { %628 = dma.done.wait [#allocation4], 64  }
  0x37   :  { %629 = vsyncadd [#allocation4], 4294967232 }
  0x38   :  { %630 = dma.done.wait [#allocation6], 2560  }
  0x39   :  { %631 = vsyncadd [#allocation6], 4294964736  ;;  %v639_v1 = vmov 0   ;;  %v534_v2 = vld [vmem:[#allocation5 + $0x4] ss:$8 sps:$4 sm:$0xff]   ;;  %vm93_vm0 = vcmask 261120  }
  0x3a   :  { %129 = vmatprep.mubr.bf16.mxu0 %v639_v1  ;;  %v536_v3 = vld [vmem:[#allocation5] ss:$8 sps:$4 sm:$0xff]   ;;  %97 = vmatprep.subr.bf16.mxu0 %v534_v2  ;;  %v537_v4 = vld [vmem:[#allocation5 + $0x14] ss:$8 sps:$4 sm:$0xff]   ;;  %v539_v5 = vld [vmem:[#allocation5 + $0x10] ss:$8 sps:$4 sm:$0xff]   ;;  %v186_v1 = vlaneseq }
  0x3b   :  { %98 = vmatpush1.bf16.msra.mxu0 %v536_v3  ;;  %v68_v6 = vld [vmem:[#allocation3] sm:$0xf]  ;;  %v540_v7 = vld [vmem:[#allocation7 + $0x40] sm:$0xff]   ;;  %v542_v9 = vld [vmem:[#allocation7 + $0x48] sm:$0xff]   ;;  %v640_v63 = vmov 1966171168  }
  0x3c   :  { %99 = vmatprep.subr.bf16.mxu0 %v537_v4  ;;  %v541_v8 = vld [vmem:[#allocation7] sm:$0xff]   ;;  %503 = vmatprep.subr.bf16.mxu1 %v540_v7  ;;  %v543_v10 = vld [vmem:[#allocation7 + $0x8] sm:$0xff]   ;;  %v544_v11 = vld [vmem:[#allocation7 + $0x50] sm:$0xff]   ;;  %v184_v0 = vunpack.c.l.s4 %v640_v63  ;;  %v187_v3 = vshrl.u32 %v186_v1, 7  ;;  %vm471_vm1 = vcmask 7168  }
  0x3d   :  { %504 = vmatpush3.bf16.msra.mxu1 %v541_v8  ;;  %v545_v12 = vld [vmem:[#allocation7 + $0x10] sm:$0xff]   ;;  %v546_v13 = vld [vmem:[#allocation7 + $0x58] sm:$0xff]   ;;  %v548_v15 = vld [vmem:[#allocation7 + $0x60] sm:$0xff]  }
  0x3e   :  { %505 = vmatprep.subr.bf16.mxu1 %v542_v9  ;;  %v547_v14 = vld [vmem:[#allocation7 + $0x18] sm:$0xff]   ;;  %v549_v16 = vld [vmem:[#allocation7 + $0x20] sm:$0xff]   ;;  %v550_v17 = vld [vmem:[#allocation7 + $0x68] sm:$0xff]   ;;  %v185_v2 = vunpack.c.0.s8 %v184_v0 }
  0x3f   :  { %100 = vmatpush1.bf16.msra.mxu0 %v539_v5  ;;  %v551_v18 = vld [vmem:[#allocation7 + $0x28] sm:$0xff]   ;;  %v552_v19 = vld [vmem:[#allocation7 + $0x70] sm:$0xff]   ;;  %v554_v21 = vld [vmem:[#allocation7 + $0x78] sm:$0xff]  }
  0x40   :  { %v553_v20 = vld [vmem:[#allocation7 + $0x30] sm:$0xff]   ;;  %v555_v22 = vld [vmem:[#allocation7 + $0x38] sm:$0xff]   ;;  %v188_v5 = vsub.s32 %v185_v2, %v187_v3 }
  0x41   :  { %506 = vmatpush3.bf16.msra.mxu1 %v543_v10  ;;  %v138_v9 = vld [vmem:[%s740_s2] ss:$2 sm:$0x3] }
  0x42   :  { %483 = vmatmul.mubr.msk.bf16.vlgmr.msra.gmra.mrb[0].mxu0 %vm93_vm0, %v68_v6  ;;  %507 = vmatprep.subr.bf16.mxu1 %v544_v11  ;;  %v202_v11 = vsub.s32 0, %v187_v3  ;;  %v501_v2 = vld [vmem:[%s743_s5] ss:$0 sm:$0xff] }
  0x45   :  { %508 = vmatpush3.bf16.msra.mxu1 %v545_v12  ;;  %v206_v12 = vsub.s32 1, %v187_v3 }
  0x46   :  { %509 = vmatprep.subr.bf16.mxu1 %v546_v13 }
  0x49   :  { %510 = vmatpush3.bf16.msra.mxu1 %v547_v14 }
  0x4a   :  { %511 = vmatprep.subr.bf16.mxu1 %v548_v15 }
  0x4d   :  { %512 = vmatpush3.bf16.msra.mxu1 %v549_v16 }
  0x4e   :  { %513 = vmatprep.subr.bf16.mxu1 %v550_v17 }
  0x51   :  { %514 = vmatpush3.bf16.msra.mxu1 %v551_v18 }
  0x52   :  { %515 = vmatprep.subr.bf16.mxu1 %v552_v19 }
  0x55   :  { %516 = vmatpush3.bf16.msra.mxu1 %v553_v20 }
  0x56   :  { %517 = vmatprep.subr.bf16.mxu1 %v554_v21 }
  0x59   :  { %518 = vmatpush3.bf16.msra.mxu1 %v555_v22  ;;  %v484_v22 = vld [vmem:[%s740_s2 + $0x1] ss:$2 sm:$0x3] }
 0x115   :  { %v131_v23 = vpop.f32.mrb[0].mxu0 }
 0x116   :  { %v141_v24 = vrot.slane %v131_v23, 4  ;;  %v156_v25 = vmul.f32 %v131_v23, %v131_v23  ;;  %v133_v26 = vpop.f32.mrb[1].mxu0 }
 0x117   :  { %v147_v27 = vrot.slane %v133_v26, 4  ;;  %v157_v28 = vmul.f32 %v133_v26, %v133_v26  ;;  %v135_v29 = vpop.f32.mrb[2].mxu0 }
 0x118   :  { %v142_v30 = vadd.f32 %v141_v24, %v131_v23  ;;  %v158_v31 = vrot.slane %v156_v25, 4  ;;  %v136_v32 = vpop.f32.mrb[3].mxu0 }
 0x119   :  { %v148_v33 = vadd.f32 %v147_v27, %v133_v26  ;;  %v164_v34 = vrot.slane %v157_v28, 4 }
 0x11a   :  { %v143_v35 = vrot.slane %v142_v30, 2  ;;  %v159_v36 = vadd.f32 %v158_v31, %v156_v25 }
 0x11b   :  { %v149_v37 = vrot.slane %v148_v33, 2  ;;  %v165_v38 = vadd.f32 %v164_v34, %v157_v28 }
 0x11c   :  { %v144_v39 = vadd.f32 %v143_v35, %v142_v30  ;;  %v160_v40 = vrot.slane %v159_v36, 2 }
 0x11d   :  { %v150_v41 = vadd.f32 %v149_v37, %v148_v33  ;;  %v166_v42 = vrot.slane %v165_v38, 2 }
 0x11e   :  { %v145_v43 = vrot.slane %v144_v39, 1  ;;  %v161_v44 = vadd.f32 %v160_v40, %v159_v36 }
 0x11f   :  { %v151_v45 = vrot.slane %v150_v41, 1  ;;  %v167_v46 = vadd.f32 %v166_v42, %v165_v38 }
 0x120   :  { %v146_v47 = vadd.f32 %v145_v43, %v144_v39  ;;  %v162_v48 = vrot.slane %v161_v44, 1 }
 0x121   :  { %v168_v49 = vrot.slane %v167_v46, 1  ;;  %v152_v50 = vadd.f32 %v151_v45, %v150_v41 }
 0x122   :  { %v154_v51 = vmul.f32 0.125, %v146_v47  ;;  %v163_v52 = vadd.f32 %v162_v48, %v161_v44 }
 0x123   :  { %v169_v53 = vadd.f32 %v168_v49, %v167_v46  ;;  %v155_v54 = vmul.f32 0.125, %v152_v50 }
 0x124   :  { %v170_v55 = vmul.f32 0.125, %v163_v52  ;;  %v172_v56 = vmul.f32 %v154_v51, %v154_v51 }
 0x125   :  { %v171_v57 = vmul.f32 0.125, %v169_v53  ;;  %v173_v58 = vmul.f32 %v155_v54, %v155_v54 }
 0x126   :  { %v174_v59 = vsub.f32 %v170_v55, %v172_v56  ;;  %v418_v56 = vld [vmem:[%s742_s4] sm:$0x1] }
 0x127   :  { %v175_v60 = vsub.f32 %v171_v57, %v173_v58 }
 0x128   :  { %v176_v61 = vadd.f32 1e-05, %v174_v59  ;;  %v419_v59 = vld [vmem:[%s742_s4 + $0x1] sm:$0x1] }
 0x129   :  { %v177_v62 = vadd.f32 1e-05, %v175_v60 }
 0x12a   :  { %556 = vrsqrt.f32 %v176_v61 }
 0x12b   :  { %558 = vrsqrt.f32 %v177_v62 }
 0x134   :  { %v557_v4 = vpop.eup %556 }
 0x135   :  { %v559_v6 = vpop.eup %558 }
 0x136   :  { %v182_v7 = vcombine.low %v557_v4, %v559_v6 }
 0x138   :  { %v189_v8 = vrot.slane %v182_v7, %v188_v5 }
 0x13a   :  { %v196_v10 = vrot.slane %v189_v8, %v188_v5 }
 0x13c   :  { %v198_v13 = vmul.f32 %v196_v10, %v138_v9 }
 0x13e   :  { %v203_v14 = vrot.slane %v198_v13, %v202_v11  ;;  %v207_v15 = vrot.slane %v198_v13, %v206_v12 }
 0x140   :  { %v210_v16 = vmul.f32 %v203_v14, %v154_v51  ;;  %v211_v17 = vmul.f32 %v207_v15, %v155_v54  ;;  %v232_v18 = vmul.f32 %v207_v15, %v133_v26  ;;  %v231_v19 = vmul.f32 %v203_v14, %v131_v23 }
 0x142   :  { %v214_v20 = vcombine.low %v210_v16, %v211_v17 }
 0x144   :  { %v221_v21 = vrot.slane %v214_v20, %v188_v5 }
 0x146   :  { %v228_v24 = vrot.slane %v221_v21, %v188_v5  ;;  %v502_v5 = vld [vmem:[#allocation2] ss:$0 sm:$0xff] }
 0x148   :  { %v230_v25 = vsub.f32 %v484_v22, %v228_v24 }
 0x14a   :  { %v241_v27 = vrot.slane %v230_v25, %v206_v12  ;;  %v237_v28 = vrot.slane %v230_v25, %v202_v11 }
 0x14c   :  { %v245_v29 = vadd.f32 %v241_v27, %v232_v18  ;;  %v244_v30 = vadd.f32 %v237_v28, %v231_v19 }
 0x14e   :  { %v247_v31 = vmax.f32 %v245_v29, 0.0  ;;  %v246_v32 = vmax.f32 %v244_v30, 0.0 }
 0x150   :  { %v249_v33 = vpack.c.bf16 %v247_v31, %v247_v31  ;;  %v248_v34 = vpack.c.bf16 %v246_v32, %v246_v32 }
 0x152   :  { %410 = vmatprep.mubr.bf16.mxu1 %v249_v33 }
 0x153   :  { %411 = vmatmul.mubr.bf16.vlgmr.msra.gmra.mrb[0].mxu1 %v248_v34 }
 0x226   :  { %v519_v26 = vpop.f32.mrb[0].mxu1 }
 0x227   :  { %v520_v23 = vpop.f32.mrb[1].mxu1 }
 0x228   :  { %v521_v35 = vadd.f32 %v520_v23, %v519_v26  ;;  %v522_v36 = vpop.f32.mrb[2].mxu1 }
 0x229   :  { %v523_v37 = vpop.f32.mrb[3].mxu1 }
 0x22a   :  { %v420_v38 = vrot.slane %v521_v35, 4  ;;  %v427_v39 = vmul.f32 %v521_v35, %v521_v35 }
 0x22c   :  { %v421_v40 = vadd.f32 %v521_v35, %v420_v38  ;;  %v428_v41 = vrot.slane %v427_v39, 4 }
 0x22e   :  { %v422_v42 = vrot.slane %v421_v40, 2  ;;  %v429_v43 = vadd.f32 %v428_v41, %v427_v39 }
 0x230   :  { %v423_v44 = vadd.f32 %v422_v42, %v421_v40  ;;  %v430_v45 = vrot.slane %v429_v43, 2 }
 0x232   :  { %v424_v46 = vrot.slane %v423_v44, 1  ;;  %v431_v47 = vadd.f32 %v430_v45, %v429_v43 }
 0x234   :  { %v432_v48 = vrot.slane %v431_v47, 1  ;;  %v425_v49 = vadd.f32 %v424_v46, %v423_v44 }
 0x236   :  { %v433_v50 = vadd.f32 %v432_v48, %v431_v47  ;;  %v426_v51 = vmul.f32 0.125, %v425_v49 }
 0x238   :  { %v434_v52 = vmul.f32 0.125, %v433_v50  ;;  %v435_v53 = vmul.f32 %v426_v51, %v426_v51 }
 0x23a   :  { %v436_v54 = vsub.f32 %v434_v52, %v435_v53 }
 0x23c   :  { %v437_v55 = vadd.f32 1e-05, %v436_v54 }
 0x23e   :  { %560 = vrsqrt.f32 %v437_v55 }
 0x248   :  { %v561_v57 = vpop.eup %560 }
 0x249   :  { %v439_v58 = vmul.f32 %v561_v57, %v418_v56 }
 0x24b   :  { %v440_v60 = vmul.f32 %v439_v58, %v426_v51  ;;  %v445_v61 = vrot.slane %v439_v58, %v202_v11 }
 0x24d   :  { %v441_v62 = vsub.f32 %v419_v59, %v440_v60  ;;  %v446_v63 = vmul.f32 %v521_v35, %v445_v61 }
 0x24f   :  { %v450_v0 = vrot.slane %v441_v62, %v202_v11 }
 0x251   :  { %v451_v1 = vadd.f32 %v450_v0, %v446_v63 }
 0x253   :  { %v452_v3 = vmax.f32 %v451_v1, 0.0 }
 0x255   :  { %v460_v4 = vmul.f32 %v501_v2, %v452_v3 }
 0x257   :  { %461 = vadd.xlane.f32.xlu0 %v460_v4 }
 0x2e4   :  { %v462_v6 = vpop.xlane.xlu0 %461 }
 0x2e5   :  { %v470_v7 = vadd.f32 %v502_v5, %v462_v6 }
 0x2e7   :  { %472 = vst.msk [vmem:[%s745_s7] sm:$0xff] %vm471_vm1, %v470_v7 }
 0x2e8   :  { %477 = vsyncpa [#allocation4], 1 }
 0x2e9   :  { %478 = vsyncpa [#allocation6], 1 }

</bundles_post_ra>
